<compile_context>
chip_gen: v7x
topology: tpu7x:2x2x1
jax: 0.10.0
libtpu: 0.0.40
codegen_flags: <defaults>
</compile_context>

<pallas_src>
import functools
import math

import jax
import jax.numpy as jnp
import numpy as np
from jax.experimental import pallas as pl
from jax.experimental.pallas import tpu as pltpu


def _round_up(x, m):
    return (x + m - 1) // m * m


def _arcface_kernel(feats_ref, w_ref, labels_ref, out_ref, *,
                    scale, cos_m, sin_m, compute_dtype):
    feats = feats_ref[...]            # (TM, D)  f32
    wn = w_ref[...]                   # (D, TN)  compute_dtype, PRE-normalized (dim=1) in wrapper
    labels = labels_ref[...]          # (TM, 1)  i32

    # F.normalize(feats, dim=1): x / max(||x||, 1e-12) == x * rsqrt(max(||x||^2, 1e-24))
    sumsq = jnp.sum(feats * feats, axis=1, keepdims=True)
    fn = feats * jax.lax.rsqrt(jnp.maximum(sumsq, 1e-24))

    # cos_theta tile on the MXU (f32 accumulation), then clip.
    cos_theta = jnp.dot(fn.astype(compute_dtype), wn,
                        preferred_element_type=jnp.float32)
    cos_theta = jnp.clip(cos_theta, -1.0 + 1e-7, 1.0 - 1e-7)

    # one-hot(labels) restricted to this class tile: offset iota by tile origin.
    tm, tn = out_ref.shape
    class_ids = jax.lax.broadcasted_iota(jnp.int32, (tm, tn), 1) + pl.program_id(1) * tn
    onehot = class_ids == labels      # (TM,1) broadcast against (TM,TN)

    # cos(acos(x) + margin) on the target class only (exact trig identity).
    sin_theta = jnp.sqrt(1.0 - cos_theta * cos_theta)
    cos_theta_m = cos_theta * cos_m - sin_theta * sin_m

    out_ref[...] = jnp.where(onehot, cos_theta_m, cos_theta) * scale


def arcface_logits(feats, weight, labels, *, scale=10.0, margin=0.5,
                   compute_dtype=jnp.float32):
    """ArcFace logits.  `compute_dtype` controls the MXU operand dtype
    (jnp.float32 for bit-faithful results, jnp.bfloat16 for bandwidth/MXU rate)."""
    B, D = feats.shape
    D2, C = weight.shape
    assert D == D2

    # --- hoisted weight normalization (F.normalize default dim=1 => per-row over n_class).
    # This is a reduction over ALL class tiles, so it must live outside the tiled kernel.
    w32 = weight.astype(jnp.float32)
    w_norm = jnp.sqrt(jnp.sum(w32 * w32, axis=1, keepdims=True))
    wn = (w32 / jnp.maximum(w_norm, 1e-12)).astype(compute_dtype)

    # --- tile sizes: TM multiple of 8 (f32 sublane), TN multiple of 128 (lane-dense out).
    TM = min(_round_up(B, 8), 128)
    Bp = _round_up(B, TM)
    TN = min(_round_up(C, 128), 512)
    Cp = _round_up(C, TN)

    # --- pad (zero columns/rows do not change the dim=1 norms already applied).
    feats_p = jnp.pad(feats.astype(jnp.float32), ((0, Bp - B), (0, 0)))
    wn_p = jnp.pad(wn, ((0, 0), (0, Cp - C)))
    labels_p = jnp.pad(labels.astype(jnp.int32).reshape(B, 1), ((0, Bp - B), (0, 0)))

    grid = (Bp // TM, Cp // TN)   # batch tiles outermost -> weight streamed once per B tile

    # --- VMEM budget: raise the scoped limit only if the double-buffered footprint needs it.
    w_elem = jnp.dtype(compute_dtype).itemsize
    footprint = 2 * (TM * D * 4 + D * TN * w_elem + TM * TN * 4 + TM * 4)
    vmem_limit = None
    if footprint > 32 * 1024 * 1024:
        vmem_limit = min(int(footprint * 1.25), 100 * 1024 * 1024)

    cost = pl.CostEstimate(
        flops=2 * Bp * D * Cp,
        transcendentals=Bp * Cp + Bp,
        bytes_accessed=Bp * D * 4 + D * Cp * w_elem + Bp * Cp * 4 + Bp * 4,
    )

    kernel = functools.partial(
        _arcface_kernel,
        scale=float(scale),
        cos_m=float(math.cos(margin)),
        sin_m=float(math.sin(margin)),
        compute_dtype=compute_dtype,
    )

    out = pl.pallas_call(
        kernel,
        out_shape=jax.ShapeDtypeStruct((Bp, Cp), jnp.float32),
        grid=grid,
        in_specs=[
            pl.BlockSpec((TM, D), lambda i, j: (i, 0)),
            pl.BlockSpec((D, TN), lambda i, j: (0, j)),
            pl.BlockSpec((TM, 1), lambda i, j: (i, 0)),
        ],
        out_specs=pl.BlockSpec((TM, TN), lambda i, j: (i, j)),
        compiler_params=pltpu.CompilerParams(
            dimension_semantics=("parallel", "parallel"),
            vmem_limit_bytes=vmem_limit,
        ),
        cost_estimate=cost,
    )(feats_p, wn_p, labels_p)

    return out[:B, :C]


def _reference(feats, weight, labels, *, scale=10.0, margin=0.5):
    # Pure-JAX mirror of the PyTorch forward (literal acos + cos form).
    fn = feats / jnp.maximum(jnp.linalg.norm(feats, axis=1, keepdims=True), 1e-12)
    wn = weight / jnp.maximum(jnp.linalg.norm(weight, axis=1, keepdims=True), 1e-12)
    cos_theta = jnp.clip(fn @ wn, -1.0 + 1e-7, 1.0 - 1e-7)
    onehot = jax.nn.one_hot(labels, weight.shape[1], dtype=jnp.float32)
    arc = jnp.arccos(cos_theta) + onehot * margin
    return jnp.cos(arc) * scale


if __name__ == "__main__":
    key = jax.random.PRNGKey(0)
    k_feat, k_w, k_lab = jax.random.split(key, 3)

    B, FEAT_DIM, N_CLASS = 8, 32, 16
    SCALE, MARGIN = 10.0, 0.5

    feats = jax.random.normal(k_feat, (B, FEAT_DIM), dtype=jnp.float32)

    # nn.Parameter(torch.rand(feat_dim, n_class)) overwritten by xavier_uniform_:
    # uniform(-bound, bound), bound = sqrt(6 / (feat_dim + n_class))
    bound = math.sqrt(6.0 / (FEAT_DIM + N_CLASS))
    weight = jax.random.uniform(
        k_w, (FEAT_DIM, N_CLASS), dtype=jnp.float32, minval=-bound, maxval=bound
    )

    labels = jax.random.randint(k_lab, (B,), 0, N_CLASS, dtype=jnp.int32)

    ref = _reference(feats, weight, labels, scale=SCALE, margin=MARGIN)

    # f32 path: bit-faithful to the PyTorch math.
    logits_f32 = arcface_logits(feats, weight, labels, scale=SCALE, margin=MARGIN,
                                compute_dtype=jnp.float32)
    logits_f32 = jax.block_until_ready(logits_f32)
    np.testing.assert_allclose(np.asarray(logits_f32), np.asarray(ref),
                               rtol=1e-5, atol=1e-4)

    # bf16-operand path (production configuration for large n_class): looser tolerance.
    logits_bf16 = arcface_logits(feats, weight, labels, scale=SCALE, margin=MARGIN,
                                 compute_dtype=jnp.bfloat16)
    logits_bf16 = jax.block_until_ready(logits_bf16)
    np.testing.assert_allclose(np.asarray(logits_bf16), np.asarray(ref),
                               rtol=0.0, atol=0.35)

    print("KERNEL_OK")
</pallas_src>

<mosaic_0001>
module attributes {stable_mosaic.version = 11 : i64} {
  func.func @_arcface_kernel(%arg0: i32, %arg1: i32, %arg2: memref<8x32xf32, #tpu.memory_space<vmem>>, %arg3: memref<32x128xf32, #tpu.memory_space<vmem>>, %arg4: memref<8x1xi32, #tpu.memory_space<vmem>>, %arg5: memref<8x128xf32, #tpu.memory_space<vmem>>) attributes {dimension_semantics = [#tpu.dimension_semantics<parallel>, #tpu.dimension_semantics<parallel>], iteration_bounds = array<i64: 1, 1>, scalar_prefetch = 0 : i64, scratch_operands = 0 : i64, tpu.core_type = #tpu.core_type<tc>, window_params = [{transform_indices = @transform_0, window_bounds = array<i64: 8, 32>}, {transform_indices = @transform_1, window_bounds = array<i64: 32, 128>}, {transform_indices = @transform_2, window_bounds = array<i64: 8, 1>}, {transform_indices = @transform_3, window_bounds = array<i64: 8, 128>}]} {
    %c0 = arith.constant 0 : index
    %c0_0 = arith.constant 0 : index
    %0 = vector.load %arg2[%c0, %c0_0] : memref<8x32xf32, #tpu.memory_space<vmem>>, vector<8x32xf32>
    %c0_1 = arith.constant 0 : index
    %c0_2 = arith.constant 0 : index
    %1 = vector.load %arg3[%c0_1, %c0_2] : memref<32x128xf32, #tpu.memory_space<vmem>>, vector<32x128xf32>
    %c0_3 = arith.constant 0 : index
    %c0_4 = arith.constant 0 : index
    %2 = vector.load %arg4[%c0_3, %c0_4] : memref<8x1xi32, #tpu.memory_space<vmem>>, vector<8x1xi32>
    %3 = arith.mulf %0, %0 : vector<8x32xf32>
    %cst = arith.constant dense<0.000000e+00> : vector<8xf32>
    %4 = vector.multi_reduction <add>, %3, %cst [1] : vector<8x32xf32> to vector<8xf32>
    %5 = vector.shape_cast %4 : vector<8xf32> to vector<8x1xf32>
    %cst_5 = arith.constant 1.000000e-24 : f32
    %6 = vector.broadcast %cst_5 : f32 to vector<8x1xf32>
    %7 = arith.maximumf %5, %6 : vector<8x1xf32>
    %8 = math.rsqrt %7 : vector<8x1xf32>
    %9 = vector.broadcast %8 : vector<8x1xf32> to vector<8x32xf32>
    %10 = arith.mulf %0, %9 : vector<8x32xf32>
    %cst_6 = arith.constant dense<0.000000e+00> : vector<8x128xf32>
    %11 = tpu.matmul %10, %1, %cst_6 {dimension_numbers = #tpu.dot_dimension_numbers<[1], [0], [0], [1], [0, 0, 1, 1], [], []>} : vector<8x32xf32>, vector<32x128xf32>, vector<8x128xf32> -> vector<8x128xf32>
    %cst_7 = arith.constant -0.99999988 : f32
    %cst_8 = arith.constant 0.99999988 : f32
    %12 = vector.broadcast %cst_7 : f32 to vector<8x128xf32>
    %13 = arith.maximumf %12, %11 : vector<8x128xf32>
    %14 = vector.broadcast %cst_8 : f32 to vector<8x128xf32>
    %15 = arith.minimumf %14, %13 : vector<8x128xf32>
    %16 = tpu.iota {dimensions = array<i32: 1>} : vector<8x128xi32>
    %c128_i32 = arith.constant 128 : i32
    %17 = arith.muli %arg1, %c128_i32 : i32
    %18 = vector.broadcast %17 : i32 to vector<8x128xi32>
    %19 = arith.addi %16, %18 : vector<8x128xi32>
    %20 = vector.broadcast %2 : vector<8x1xi32> to vector<8x128xi32>
    %21 = arith.cmpi eq, %19, %20 : vector<8x128xi32>
    %22 = arith.mulf %15, %15 : vector<8x128xf32>
    %cst_9 = arith.constant 1.000000e+00 : f32
    %23 = vector.broadcast %cst_9 : f32 to vector<8x128xf32>
    %24 = arith.subf %23, %22 : vector<8x128xf32>
    %25 = math.sqrt %24 : vector<8x128xf32>
    %cst_10 = arith.constant 0.87758255 : f32
    %26 = vector.broadcast %cst_10 : f32 to vector<8x128xf32>
    %27 = arith.mulf %15, %26 : vector<8x128xf32>
    %cst_11 = arith.constant 0.47942555 : f32
    %28 = vector.broadcast %cst_11 : f32 to vector<8x128xf32>
    %29 = arith.mulf %25, %28 : vector<8x128xf32>
    %30 = arith.subf %27, %29 : vector<8x128xf32>
    %31 = arith.select %21, %30, %15 : vector<8x128xi1>, vector<8x128xf32>
    %cst_12 = arith.constant 1.000000e+01 : f32
    %32 = vector.broadcast %cst_12 : f32 to vector<8x128xf32>
    %33 = arith.mulf %31, %32 : vector<8x128xf32>
    %c0_13 = arith.constant 0 : index
    %c0_14 = arith.constant 0 : index
    %34 = vector.load %arg5[%c0_13, %c0_14] : memref<8x128xf32, #tpu.memory_space<vmem>>, vector<8x128xf32>
    tpu.vector_store %arg5[%c0_13, %c0_14], %33 {strides = array<i32>} : memref<8x128xf32, #tpu.memory_space<vmem>>, vector<8x128xf32>,
    return
  }
  func.func @transform_0(%arg0: i32, %arg1: i32) -> (i32, i32) {
    %c0_i32 = arith.constant 0 : i32
    %c0_i32_0 = arith.constant 0 : i32
    return %arg0, %c0_i32 : i32, i32
  }
  func.func @transform_1(%arg0: i32, %arg1: i32) -> (i32, i32) {
    %c0_i32 = arith.constant 0 : i32
    %c0_i32_0 = arith.constant 0 : i32
    return %c0_i32, %arg1 : i32, i32
  }
  func.func @transform_2(%arg0: i32, %arg1: i32) -> (i32, i32) {
    %c0_i32 = arith.constant 0 : i32
    %c0_i32_0 = arith.constant 0 : i32
    return %arg0, %c0_i32 : i32, i32
  }
  func.func @transform_3(%arg0: i32, %arg1: i32) -> (i32, i32) {
    %c0_i32 = arith.constant 0 : i32
    return %arg0, %arg1 : i32, i32
  }
}

</mosaic_0001>

<bundles_post_ra>
// kernel: tpu_custom_call.1
= control target key start
LH: loop header
LB: loop body
LE: loop exit
PB: predicated region body
PF: predicated region fallthrough
CT: control target
= control target key end

     0   :  { %8 = vsyncpa [#allocation3], 0  ;;  %s302_s0 = inlined_call_operand.vmem [shape: f32[8,32], index: 0, kind: input, shape index: {}]   ;;  %s303_s1 = inlined_call_operand.hbm [shape: f32[32,128], index: 1, kind: input, shape index: {}]   ;;  %s304_s2 = inlined_call_operand.vmem [shape: s32[8,1], index: 2, kind: input, shape index: {}]   ;;  %s305_s3 = inlined_call_operand.hbm [shape: f32[8,128], index: 3, kind: output, shape index: {}]  }
   0x1   :  { %9 = vsyncpa [#allocation4], 0  ;;  %s242_s12 = smov [#allocation2]   ;;  %s194_s16 = scalar_lea.hbm %s303_s1, 512 }
   0x2   :  { %s17_s13 = sshll.u32 %s242_s12, 4  ;;  %p195_p0 = scmp.ne.s32.totalorder %s303_s1, %s194_s16  ;;  %s18_s13 = int_to_ptr.vmem [resolvable:$true] %s17_s13 }
   0x3   :  { %p198_p1 = scmp.lt.u32.totalorder %s194_s16, %s303_s1 }
   0x5   :  { %p200_p2 = pnand %p198_p1, %p195_p0 }
   0x7   :  { %203 = shalt.err (!%p200_p2)
}
   0x8   :  { %s204_s21 = scalar_lea.vmem %s18_s13, 512  ;;  %p209_p4 = scmp.lt.s32.totalorder %s18_s13, %s18_s13 }
   0x9   :  { %p205_p3 = scmp.ne.s32.totalorder %s18_s13, %s204_s21  ;;  %p210_p5 = scmp.lt.s32.totalorder %s204_s21, %s204_s21 }
   0xb   :  { %p211_p6 = por %p210_p5, %p209_p4 }
   0xd   :  { %p212_p7 = pnand %p211_p6, %p205_p3 }
   0xf   :  { %215 = shalt.err (!%p212_p7)
}
  0x10   :  { %s243_s22 = smov 128   ;;  %s244_s23 = smov 8  }
  0x11   :  { %23 = dma.hbm_to_vmem [thread:$0]  %s303_s1, 512, %s18_s13, [#allocation3], %s243_s22, %s243_s22, %s244_s23  }
  0x12   :  { %238 = dma.done.wait [#allocation3], 512  }
  0x13   :  { %239 = vsyncadd [#allocation3], 4294966784  ;;  %v29_v0 = vld [vmem:[%s302_s0] sm:$0xff]  ;;  %vm36_vm0 = vcmask 261120   ;;  %v31_v4 = vld [vmem:[#allocation2 + $0x8] sm:$0xff]  ;;  %v245_v6 = vmov 0.0|0.0   ;;  %v118_v22 = vlaneseq }
  0x14   :  { %v35_v1 = vmul.f32 %v29_v0, %v29_v0  ;;  %v30_v3 = vld [vmem:[#allocation2] sm:$0xff]  ;;  %v32_v5 = vld [vmem:[#allocation2 + $0x10] sm:$0xff]  ;;  %175 = vmatprep.subr.bf16.mxu0 %v245_v6  ;;  %v33_v8 = vld [vmem:[#allocation2 + $0x18] sm:$0xff]  ;;  %vm246_vm1 = vmmov 0   ;;  %v247_v9 = vmov 0.0   ;;  %v248_v12 = vmov 0  }
  0x15   :  { %v176_v7 = vpack.c.bf16 %v31_v4, %v30_v3  ;;  %172 = vmatprep.mubr.msk.f32.mxu0 %vm246_vm1, %v247_v9  ;;  %v179_v10 = vpack.c.bf16 %v33_v8, %v32_v5  ;;  %v34_v11 = vld [vmem:[%s304_s2] sm:$0xff]  ;;  %189 = vset.pattern.permute.xlu0 %v248_v12  ;;  %v119_v26 = vand.u32 127, %v118_v22  ;;  %s249_s2 = smov [#allocation5]  }
  0x16   :  { %v37_v2 = vsel %vm36_vm0, %v35_v1, 0.0  ;;  %s148_s28 = sshll.u32 %s249_s2, 4  ;;  %s149_s28 = int_to_ptr.vmem [resolvable:$true] %s148_s28 }
  0x17   :  { %38 = vadd.xlane.f32.xlu0 %v37_v2  ;;  %177 = vmatpush3.bf16.msra.mxu0 %v176_v7  ;;  %s216_s29 = scalar_lea.vmem %s149_s28, 128  ;;  %p221_p9 = scmp.lt.s32.totalorder %s149_s28, %s149_s28 }
  0x18   :  { %178 = vmatprep.subr.bf16.mxu0 %v245_v6  ;;  %p217_p8 = scmp.ne.s32.totalorder %s149_s28, %s216_s29  ;;  %p222_p10 = scmp.lt.s32.totalorder %s216_s29, %s216_s29 }
  0x1a   :  { %p223_p11 = por %p222_p10, %p221_p9 }
  0x1b   :  { %180 = vmatpush3.bf16.msra.mxu0 %v179_v10 }
  0x1c   :  { %p224_p12 = pnand %p223_p11, %p217_p8 }
  0x2d   :  { %124 = vperm.xlu0 %189, %v34_v11  }
  0xa4   :  { %v39_v13 = vpop.xlane.xlu0 %38 }
  0xa5   :  { %v40_v14 = vmax.f32 %v39_v13, 1e-24 }
  0xa7   :  { %190 = vrsqrt.f32 %v40_v14 }
  0xac   :  { %v125_v28 = vpop.permute.xlu0 %124 }
  0xad   :  { %vm126_vm4 = vcmp.eq.s32.totalorder %v119_v26, %v125_v28 }
  0xb1   :  { %v191_v15 = vpop.eup %190 }
  0xb2   :  { %v42_v16 = vmul.f32 %v191_v15, %v29_v0 }
  0xb4   :  { %173 = vmatmul.mubr.msk.f32.vlgmr.msra.gmra.mrb[0].mxu0 %vm36_vm0, %v42_v16 }
 0x187   :  { %v112_v17 = vpop.f32.mrb[0].mxu0 }
 0x188   :  { %v158_v18 = vclamps-f32 %v112_v17, 0.9999999  ;;  %v174_v19 = vpop.f32.mrb[1].mxu0 }
 0x18a   :  { %v127_v20 = vmul.f32 %v158_v18, %v158_v18  ;;  %v136_v30 = vmul.f32 0.87758255, %v158_v18 }
 0x18c   :  { %v128_v21 = vsub.f32 1.0, %v127_v20 }
 0x18e   :  { %192 = vrsqrt.f32 %v128_v21  ;;  %vm131_vm2 = vcmp.eq.f32.partialorder %v128_v21, inf  ;;  %v134_v25 = vand.u32 2147483648, %v128_v21  ;;  %vm133_vm3 = vcmp.eq.f32.partialorder %v128_v21, 0.0 }
 0x198   :  { %v193_v23 = vpop.eup %192 }
 0x199   :  { %v130_v24 = vmul.f32 %v193_v23, %v128_v21 }
 0x19b   :  { %v132_v27 = vsel %vm131_vm2, %v128_v21, %v130_v24 }
 0x19c   :  { %v135_v29 = vsel %vm133_vm3, %v134_v25, %v132_v27 }
 0x19d   :  { %v137_v31 = vmul.f32 0.47942555, %v135_v29 }
 0x19f   :  { %v138_v32 = vsub.f32 %v136_v30, %v137_v31 }
 0x1a1   :  { %v139_v33 = vsel %vm126_vm4, %v138_v32, %v158_v18 }
 0x1a2   :  { %v140_v34 = vmul.f32 10.0, %v139_v33 }
 0x1a4   :  { %141 = vst [vmem:[#allocation5] sm:$0xff] %v140_v34 }
 0x1a5   :  { %227 = shalt.err (!%p224_p12)
}
 0x1a6   :  { %s228_s5 = scalar_lea.hbm %s305_s3, 128 }
 0x1a7   :  { %p229_p13 = scmp.ne.s32.totalorder %s305_s3, %s228_s5  ;;  %p232_p0 = scmp.lt.u32.totalorder %s228_s5, %s305_s3 }
 0x1a9   :  { %p234_p1 = pnand %p232_p0, %p229_p13 }
 0x1ab   :  { %237 = shalt.err (!%p234_p1)
}
 0x1ac   :  { %151 = dma.vmem_to_hbm [thread:$0]  %s149_s28, 128, %s305_s3, [#allocation4]  }
 0x1ad   :  { %240 = dma.done.wait [#allocation4], 128  }
 0x1ae   :  { %241 = vsyncadd [#allocation4], 4294967168 }
 0x1af   :  { %155 = vsyncpa [#allocation3], 1 }
 0x1b0   :  { %156 = vsyncpa [#allocation4], 1 }

</bundles_post_ra>
